<compile_context>
chip_gen: v5e
topology: v5e:2x2
jax: 0.10.0
libtpu: 0.0.40
codegen_flags: <defaults>
</compile_context>

<pallas_src>
import functools

import jax
import jax.numpy as jnp
from jax.experimental import pallas as pl
from jax.experimental.pallas import tpu as pltpu

EPS = 1e-5  # nn.BatchNorm2d default eps


def _conv_stats_kernel(xflat_ref, wtap_ref, bias_ref, valid_ref,
                       y_ref, sum_ref, ssq_ref,
                       *, C_out, KH, KW, Wp, L_out):
    # xflat_ref: (1, C_in, L_in)   wtap_ref: (KH*KW, C_out, C_in)
    # bias_ref : (C_out, 1)        valid_ref: (1, L_out)
    # y_ref    : (1, C_out, L_out) sum_ref/ssq_ref: (1, C_out, 1)
    xf = xflat_ref[0]                                  # (C_in, L_in)
    acc = jnp.zeros((C_out, L_out), jnp.float32)
    for ky in range(KH):
        for kx in range(KW):
            off = ky * Wp + kx                         # static lane offset per tap
            x_tap = xf[:, off:off + L_out]             # (C_in, L_out) static slice
            w_tap = wtap_ref[ky * KW + kx]             # (C_out, C_in)
            acc = acc + jnp.dot(w_tap, x_tap, preferred_element_type=jnp.float32)
    y = acc + bias_ref[...]                            # broadcast bias over lanes
    y_ref[0] = y
    # Partial BatchNorm statistics over the valid spatial positions only.
    yv = y * valid_ref[...]
    sum_ref[0] = jnp.sum(yv, axis=1, keepdims=True)
    ssq_ref[0] = jnp.sum(yv * yv, axis=1, keepdims=True)


def _bn_relu_kernel(y_ref, scale_ref, shift_ref, o_ref):
    # y_ref: (1, C_out, TL)   scale/shift: (C_out, 1)   o_ref: (1, C_out, TL)
    o_ref[0] = jnp.maximum(y_ref[0] * scale_ref[...] + shift_ref[...], 0.0)


def block_bn_pallas(x, weight, bias, gamma, beta, *, stride=1):
    """x: (B, C_in, H, W) f32; weight: (C_out, C_in, K, K); bias/gamma/beta: (C_out,)."""
    B, C_in, H, W = x.shape
    C_out, C_in_w, KH, KW = weight.shape
    assert C_in_w == C_in
    # TODO(synk): stride > 1 convolution is not implemented in the Pallas path.
    assert stride == 1, "Pallas path supports stride == 1 only"

    pad = KH // 2
    xpad = jnp.pad(x, ((0, 0), (0, 0), (pad, pad), (pad, pad)), mode="reflect")
    Hp, Wp = H + 2 * pad, W + 2 * pad
    H_out, W_out = Hp - KH + 1, Wp - KW + 1
    HWp = H_out * Wp                                  # flat length of wide output

    # Lane tile / padded flat-output length (multiple of 128 and of the tile).
    TL = 128 * int(min(pl.cdiv(HWp, 128), 32))        # <= 4096 lanes per tile
    L_out = TL * int(pl.cdiv(HWp, TL))
    max_off = (KH - 1) * Wp + (KW - 1)
    L_in = 128 * int(pl.cdiv(max_off + L_out, 128))

    xflat = xpad.reshape(B, C_in, Hp * Wp).astype(jnp.float32)
    xflat = jnp.pad(xflat, ((0, 0), (0, 0), (0, L_in - Hp * Wp)))

    # Per-tap (C_out, C_in) weight matrices; tap index = ky*KW + kx.
    w_taps = jnp.transpose(weight.astype(jnp.float32), (2, 3, 0, 1)).reshape(
        KH * KW, C_out, C_in)
    b_col = bias.astype(jnp.float32).reshape(C_out, 1)

    lane = jnp.arange(L_out, dtype=jnp.int32)
    valid = ((lane < HWp) & ((lane % Wp) < W_out)).astype(jnp.float32).reshape(1, L_out)

    kernel1 = functools.partial(_conv_stats_kernel, C_out=C_out, KH=KH, KW=KW,
                                Wp=Wp, L_out=L_out)
    y, psum, pssq = pl.pallas_call(
        kernel1,
        out_shape=(
            jax.ShapeDtypeStruct((B, C_out, L_out), jnp.float32),
            jax.ShapeDtypeStruct((B, C_out, 1), jnp.float32),
            jax.ShapeDtypeStruct((B, C_out, 1), jnp.float32),
        ),
        grid_spec=pltpu.PrefetchScalarGridSpec(
            num_scalar_prefetch=0,
            grid=(B,),
            in_specs=[
                pl.BlockSpec((1, C_in, L_in), lambda b: (b, 0, 0)),
                pl.BlockSpec((KH * KW, C_out, C_in), lambda b: (0, 0, 0)),
                pl.BlockSpec((C_out, 1), lambda b: (0, 0)),
                pl.BlockSpec((1, L_out), lambda b: (0, 0)),
            ],
            out_specs=[
                pl.BlockSpec((1, C_out, L_out), lambda b: (b, 0, 0)),
                pl.BlockSpec((1, C_out, 1), lambda b: (b, 0, 0)),
                pl.BlockSpec((1, C_out, 1), lambda b: (b, 0, 0)),
            ],
        ),
        compiler_params=pltpu.CompilerParams(
            dimension_semantics=("parallel",),
            vmem_limit_bytes=32 * 1024 * 1024,
        ),
    )(xflat, w_taps, b_col, valid)

    # BatchNorm2d training-mode batch statistics (biased variance) folded into a
    # per-channel scale/shift -- tiny (C_out,)-sized math in plain JAX.
    count = jnp.float32(B * H_out * W_out)
    mean = jnp.sum(psum[:, :, 0], axis=0) / count
    ex2 = jnp.sum(pssq[:, :, 0], axis=0) / count
    var = jnp.maximum(ex2 - mean * mean, 0.0)
    scale = gamma.astype(jnp.float32) * jax.lax.rsqrt(var + EPS)
    shift = beta.astype(jnp.float32) - mean * scale
    scale = scale.reshape(C_out, 1)
    shift = shift.reshape(C_out, 1)

    n_tiles = L_out // TL
    y_norm = pl.pallas_call(
        _bn_relu_kernel,
        out_shape=jax.ShapeDtypeStruct((B, C_out, L_out), jnp.float32),
        grid_spec=pltpu.PrefetchScalarGridSpec(
            num_scalar_prefetch=0,
            grid=(B, n_tiles),
            in_specs=[
                pl.BlockSpec((1, C_out, TL), lambda b, t: (b, 0, t)),
                pl.BlockSpec((C_out, 1), lambda b, t: (0, 0)),
                pl.BlockSpec((C_out, 1), lambda b, t: (0, 0)),
            ],
            out_specs=pl.BlockSpec((1, C_out, TL), lambda b, t: (b, 0, t)),
        ),
        compiler_params=pltpu.CompilerParams(
            dimension_semantics=("parallel", "parallel"),
            vmem_limit_bytes=32 * 1024 * 1024,
        ),
    )(y, scale, shift)

    # Drop flat/width padding: (B, C_out, L_out) -> (B, C_out, H_out, W_out).
    out = y_norm[:, :, :HWp].reshape(B, C_out, H_out, Wp)[:, :, :, :W_out]
    return out


def _reference(x, weight, bias, gamma, beta):
    pad = weight.shape[-1] // 2
    xpad = jnp.pad(x, ((0, 0), (0, 0), (pad, pad), (pad, pad)), mode="reflect")
    y = jax.lax.conv_general_dilated(
        xpad, weight, window_strides=(1, 1), padding="VALID",
        dimension_numbers=("NCHW", "OIHW", "NCHW"),
    ) + bias[None, :, None, None]
    mean = y.mean(axis=(0, 2, 3), keepdims=True)
    var = ((y - mean) ** 2).mean(axis=(0, 2, 3), keepdims=True)
    yn = (y - mean) * jax.lax.rsqrt(var + EPS)
    yn = yn * gamma[None, :, None, None] + beta[None, :, None, None]
    return jnp.maximum(yn, 0.0)


if __name__ == "__main__":
    B, in_c, H, W = 2, 4, 16, 16
    out_c, ksize, stride = 8, 3, 1

    key = jax.random.PRNGKey(0)
    kx, kw, kb = jax.random.split(key, 3)

    x = jax.random.normal(kx, (B, in_c, H, W), dtype=jnp.float32)

    # conv.weight: xavier_normal_ (std = sqrt(2/(fan_in+fan_out)));
    # conv.bias: Conv2d default U(-1/sqrt(fan_in), 1/sqrt(fan_in));
    # BatchNorm2d affine init: gamma = 1, beta = 0.
    fan_in = in_c * ksize * ksize
    fan_out = out_c * ksize * ksize
    std = (2.0 / (fan_in + fan_out)) ** 0.5
    weight = std * jax.random.normal(kw, (out_c, in_c, ksize, ksize), dtype=jnp.float32)
    bound = 1.0 / (fan_in ** 0.5)
    bias = jax.random.uniform(kb, (out_c,), minval=-bound, maxval=bound,
                              dtype=jnp.float32)
    gamma = jnp.ones((out_c,), jnp.float32)
    beta = jnp.zeros((out_c,), jnp.float32)

    out = block_bn_pallas(x, weight, bias, gamma, beta, stride=stride)
    out = jax.block_until_ready(out)

    ref = _reference(x, weight, bias, gamma, beta)
    assert out.shape == (B, out_c, H, W)
    assert jnp.allclose(out, ref, atol=1e-4, rtol=1e-4), "mismatch vs reference"

    print("KERNEL_OK")
</pallas_src>

<mosaic_0001>
module attributes {stable_mosaic.version = 11 : i64} {
  func.func @_conv_stats_kernel(%arg0: i32, %arg1: memref<1x4x512xf32, #tpu.memory_space<vmem>>, %arg2: memref<9x8x4xf32, #tpu.memory_space<vmem>>, %arg3: memref<8x1xf32, #tpu.memory_space<vmem>>, %arg4: memref<1x384xf32, #tpu.memory_space<vmem>>, %arg5: memref<1x8x384xf32, #tpu.memory_space<vmem>>, %arg6: memref<1x8x1xf32, #tpu.memory_space<vmem>>, %arg7: memref<1x8x1xf32, #tpu.memory_space<vmem>>) attributes {dimension_semantics = [#tpu.dimension_semantics<parallel>], iteration_bounds = array<i64: 2>, scalar_prefetch = 0 : i64, scratch_operands = 0 : i64, tpu.core_type = #tpu.core_type<tc>, window_params = [{transform_indices = @transform_0, window_bounds = array<i64: 1, 4, 512>}, {pipeline_mode = #tpu.pipeline_mode<synchronous>, transform_indices = @transform_1, window_bounds = array<i64: 9, 8, 4>}, {pipeline_mode = #tpu.pipeline_mode<synchronous>, transform_indices = @transform_2, window_bounds = array<i64: 8, 1>}, {pipeline_mode = #tpu.pipeline_mode<synchronous>, transform_indices = @transform_3, window_bounds = array<i64: 1, 384>}, {transform_indices = @transform_4, window_bounds = array<i64: 1, 8, 384>}, {transform_indices = @transform_5, window_bounds = array<i64: 1, 8, 1>}, {transform_indices = @transform_6, window_bounds = array<i64: 1, 8, 1>}]} {
    %c0 = arith.constant 0 : index
    %c0_0 = arith.constant 0 : index
    %c0_1 = arith.constant 0 : index
    %0 = vector.load %arg1[%c0, %c0_0, %c0_1] : memref<1x4x512xf32, #tpu.memory_space<vmem>>, vector<1x4x512xf32>
    %1 = vector.shape_cast %0 : vector<1x4x512xf32> to vector<4x512xf32>
    %cst = arith.constant 0.000000e+00 : f32
    %2 = vector.broadcast %cst : f32 to vector<8x384xf32>
    %3 = vector.extract_strided_slice %1 {offsets = [0, 0], sizes = [4, 384], strides = [1, 1]} : vector<4x512xf32> to vector<4x384xf32>
    %c0_2 = arith.constant 0 : index
    %c0_3 = arith.constant 0 : index
    %c0_4 = arith.constant 0 : index
    %4 = vector.load %arg2[%c0_2, %c0_3, %c0_4] : memref<9x8x4xf32, #tpu.memory_space<vmem>>, vector<1x8x4xf32>
    %5 = vector.shape_cast %4 : vector<1x8x4xf32> to vector<8x4xf32>
    %cst_5 = arith.constant dense<0.000000e+00> : vector<8x384xf32>
    %6 = tpu.matmul %5, %3, %cst_5 {dimension_numbers = #tpu.dot_dimension_numbers<[1], [0], [0], [1], [0, 0, 1, 1], [], []>} : vector<8x4xf32>, vector<4x384xf32>, vector<8x384xf32> -> vector<8x384xf32>
    %7 = arith.addf %2, %6 : vector<8x384xf32>
    %8 = vector.extract_strided_slice %1 {offsets = [0, 1], sizes = [4, 384], strides = [1, 1]} : vector<4x512xf32> to vector<4x384xf32>
    %c1 = arith.constant 1 : index
    %c0_6 = arith.constant 0 : index
    %c0_7 = arith.constant 0 : index
    %9 = vector.load %arg2[%c1, %c0_6, %c0_7] : memref<9x8x4xf32, #tpu.memory_space<vmem>>, vector<1x8x4xf32>
    %10 = vector.shape_cast %9 : vector<1x8x4xf32> to vector<8x4xf32>
    %cst_8 = arith.constant dense<0.000000e+00> : vector<8x384xf32>
    %11 = tpu.matmul %10, %8, %cst_8 {dimension_numbers = #tpu.dot_dimension_numbers<[1], [0], [0], [1], [0, 0, 1, 1], [], []>} : vector<8x4xf32>, vector<4x384xf32>, vector<8x384xf32> -> vector<8x384xf32>
    %12 = arith.addf %7, %11 : vector<8x384xf32>
    %13 = vector.extract_strided_slice %1 {offsets = [0, 2], sizes = [4, 384], strides = [1, 1]} : vector<4x512xf32> to vector<4x384xf32>
    %c2 = arith.constant 2 : index
    %c0_9 = arith.constant 0 : index
    %c0_10 = arith.constant 0 : index
    %14 = vector.load %arg2[%c2, %c0_9, %c0_10] : memref<9x8x4xf32, #tpu.memory_space<vmem>>, vector<1x8x4xf32>
    %15 = vector.shape_cast %14 : vector<1x8x4xf32> to vector<8x4xf32>
    %cst_11 = arith.constant dense<0.000000e+00> : vector<8x384xf32>
    %16 = tpu.matmul %15, %13, %cst_11 {dimension_numbers = #tpu.dot_dimension_numbers<[1], [0], [0], [1], [0, 0, 1, 1], [], []>} : vector<8x4xf32>, vector<4x384xf32>, vector<8x384xf32> -> vector<8x384xf32>
    %17 = arith.addf %12, %16 : vector<8x384xf32>
    %18 = vector.extract_strided_slice %1 {offsets = [0, 18], sizes = [4, 384], strides = [1, 1]} : vector<4x512xf32> to vector<4x384xf32>
    %c3 = arith.constant 3 : index
    %c0_12 = arith.constant 0 : index
    %c0_13 = arith.constant 0 : index
    %19 = vector.load %arg2[%c3, %c0_12, %c0_13] : memref<9x8x4xf32, #tpu.memory_space<vmem>>, vector<1x8x4xf32>
    %20 = vector.shape_cast %19 : vector<1x8x4xf32> to vector<8x4xf32>
    %cst_14 = arith.constant dense<0.000000e+00> : vector<8x384xf32>
    %21 = tpu.matmul %20, %18, %cst_14 {dimension_numbers = #tpu.dot_dimension_numbers<[1], [0], [0], [1], [0, 0, 1, 1], [], []>} : vector<8x4xf32>, vector<4x384xf32>, vector<8x384xf32> -> vector<8x384xf32>
    %22 = arith.addf %17, %21 : vector<8x384xf32>
    %23 = vector.extract_strided_slice %1 {offsets = [0, 19], sizes = [4, 384], strides = [1, 1]} : vector<4x512xf32> to vector<4x384xf32>
    %c4 = arith.constant 4 : index
    %c0_15 = arith.constant 0 : index
    %c0_16 = arith.constant 0 : index
    %24 = vector.load %arg2[%c4, %c0_15, %c0_16] : memref<9x8x4xf32, #tpu.memory_space<vmem>>, vector<1x8x4xf32>
    %25 = vector.shape_cast %24 : vector<1x8x4xf32> to vector<8x4xf32>
    %cst_17 = arith.constant dense<0.000000e+00> : vector<8x384xf32>
    %26 = tpu.matmul %25, %23, %cst_17 {dimension_numbers = #tpu.dot_dimension_numbers<[1], [0], [0], [1], [0, 0, 1, 1], [], []>} : vector<8x4xf32>, vector<4x384xf32>, vector<8x384xf32> -> vector<8x384xf32>
    %27 = arith.addf %22, %26 : vector<8x384xf32>
    %28 = vector.extract_strided_slice %1 {offsets = [0, 20], sizes = [4, 384], strides = [1, 1]} : vector<4x512xf32> to vector<4x384xf32>
    %c5 = arith.constant 5 : index
    %c0_18 = arith.constant 0 : index
    %c0_19 = arith.constant 0 : index
    %29 = vector.load %arg2[%c5, %c0_18, %c0_19] : memref<9x8x4xf32, #tpu.memory_space<vmem>>, vector<1x8x4xf32>
    %30 = vector.shape_cast %29 : vector<1x8x4xf32> to vector<8x4xf32>
    %cst_20 = arith.constant dense<0.000000e+00> : vector<8x384xf32>
    %31 = tpu.matmul %30, %28, %cst_20 {dimension_numbers = #tpu.dot_dimension_numbers<[1], [0], [0], [1], [0, 0, 1, 1], [], []>} : vector<8x4xf32>, vector<4x384xf32>, vector<8x384xf32> -> vector<8x384xf32>
    %32 = arith.addf %27, %31 : vector<8x384xf32>
    %33 = vector.extract_strided_slice %1 {offsets = [0, 36], sizes = [4, 384], strides = [1, 1]} : vector<4x512xf32> to vector<4x384xf32>
    %c6 = arith.constant 6 : index
    %c0_21 = arith.constant 0 : index
    %c0_22 = arith.constant 0 : index
    %34 = vector.load %arg2[%c6, %c0_21, %c0_22] : memref<9x8x4xf32, #tpu.memory_space<vmem>>, vector<1x8x4xf32>
    %35 = vector.shape_cast %34 : vector<1x8x4xf32> to vector<8x4xf32>
    %cst_23 = arith.constant dense<0.000000e+00> : vector<8x384xf32>
    %36 = tpu.matmul %35, %33, %cst_23 {dimension_numbers = #tpu.dot_dimension_numbers<[1], [0], [0], [1], [0, 0, 1, 1], [], []>} : vector<8x4xf32>, vector<4x384xf32>, vector<8x384xf32> -> vector<8x384xf32>
    %37 = arith.addf %32, %36 : vector<8x384xf32>
    %38 = vector.extract_strided_slice %1 {offsets = [0, 37], sizes = [4, 384], strides = [1, 1]} : vector<4x512xf32> to vector<4x384xf32>
    %c7 = arith.constant 7 : index
    %c0_24 = arith.constant 0 : index
    %c0_25 = arith.constant 0 : index
    %39 = vector.load %arg2[%c7, %c0_24, %c0_25] : memref<9x8x4xf32, #tpu.memory_space<vmem>>, vector<1x8x4xf32>
    %40 = vector.shape_cast %39 : vector<1x8x4xf32> to vector<8x4xf32>
    %cst_26 = arith.constant dense<0.000000e+00> : vector<8x384xf32>
    %41 = tpu.matmul %40, %38, %cst_26 {dimension_numbers = #tpu.dot_dimension_numbers<[1], [0], [0], [1], [0, 0, 1, 1], [], []>} : vector<8x4xf32>, vector<4x384xf32>, vector<8x384xf32> -> vector<8x384xf32>
    %42 = arith.addf %37, %41 : vector<8x384xf32>
    %43 = vector.extract_strided_slice %1 {offsets = [0, 38], sizes = [4, 384], strides = [1, 1]} : vector<4x512xf32> to vector<4x384xf32>
    %c8 = arith.constant 8 : index
    %c0_27 = arith.constant 0 : index
    %c0_28 = arith.constant 0 : index
    %44 = vector.load %arg2[%c8, %c0_27, %c0_28] : memref<9x8x4xf32, #tpu.memory_space<vmem>>, vector<1x8x4xf32>
    %45 = vector.shape_cast %44 : vector<1x8x4xf32> to vector<8x4xf32>
    %cst_29 = arith.constant dense<0.000000e+00> : vector<8x384xf32>
    %46 = tpu.matmul %45, %43, %cst_29 {dimension_numbers = #tpu.dot_dimension_numbers<[1], [0], [0], [1], [0, 0, 1, 1], [], []>} : vector<8x4xf32>, vector<4x384xf32>, vector<8x384xf32> -> vector<8x384xf32>
    %47 = arith.addf %42, %46 : vector<8x384xf32>
    %c0_30 = arith.constant 0 : index
    %c0_31 = arith.constant 0 : index
    %48 = vector.load %arg3[%c0_30, %c0_31] : memref<8x1xf32, #tpu.memory_space<vmem>>, vector<8x1xf32>
    %49 = vector.broadcast %48 : vector<8x1xf32> to vector<8x384xf32>
    %50 = arith.addf %47, %49 : vector<8x384xf32>
    %c0_32 = arith.constant 0 : index
    %c0_33 = arith.constant 0 : index
    %c0_34 = arith.constant 0 : index
    %51 = vector.load %arg5[%c0_32, %c0_33, %c0_34] : memref<1x8x384xf32, #tpu.memory_space<vmem>>, vector<1x8x384xf32>
    %52 = vector.shape_cast %51 : vector<1x8x384xf32> to vector<8x384xf32>
    %53 = vector.shape_cast %50 : vector<8x384xf32> to vector<1x8x384xf32>
    tpu.vector_store %arg5[%c0_32, %c0_33, %c0_34], %53 {strides = array<i32>} : memref<1x8x384xf32, #tpu.memory_space<vmem>>, vector<1x8x384xf32>,
    %c0_35 = arith.constant 0 : index
    %c0_36 = arith.constant 0 : index
    %54 = vector.load %arg4[%c0_35, %c0_36] : memref<1x384xf32, #tpu.memory_space<vmem>>, vector<1x384xf32>
    %55 = vector.broadcast %54 : vector<1x384xf32> to vector<8x384xf32>
    %56 = arith.mulf %50, %55 : vector<8x384xf32>
    %cst_37 = arith.constant dense<0.000000e+00> : vector<8xf32>
    %57 = vector.multi_reduction <add>, %56, %cst_37 [1] : vector<8x384xf32> to vector<8xf32>
    %58 = vector.shape_cast %57 : vector<8xf32> to vector<8x1xf32>
    %c0_38 = arith.constant 0 : index
    %c0_39 = arith.constant 0 : index
    %c0_40 = arith.constant 0 : index
    %59 = vector.load %arg6[%c0_38, %c0_39, %c0_40] : memref<1x8x1xf32, #tpu.memory_space<vmem>>, vector<1x8x1xf32>
    %60 = vector.shape_cast %59 : vector<1x8x1xf32> to vector<8x1xf32>
    %61 = vector.shape_cast %58 : vector<8x1xf32> to vector<1x8x1xf32>
    tpu.vector_store %arg6[%c0_38, %c0_39, %c0_40], %61 {strides = array<i32>} : memref<1x8x1xf32, #tpu.memory_space<vmem>>, vector<1x8x1xf32>,
    %62 = arith.mulf %56, %56 : vector<8x384xf32>
    %cst_41 = arith.constant dense<0.000000e+00> : vector<8xf32>
    %63 = vector.multi_reduction <add>, %62, %cst_41 [1] : vector<8x384xf32> to vector<8xf32>
    %64 = vector.shape_cast %63 : vector<8xf32> to vector<8x1xf32>
    %c0_42 = arith.constant 0 : index
    %c0_43 = arith.constant 0 : index
    %c0_44 = arith.constant 0 : index
    %65 = vector.load %arg7[%c0_42, %c0_43, %c0_44] : memref<1x8x1xf32, #tpu.memory_space<vmem>>, vector<1x8x1xf32>
    %66 = vector.shape_cast %65 : vector<1x8x1xf32> to vector<8x1xf32>
    %67 = vector.shape_cast %64 : vector<8x1xf32> to vector<1x8x1xf32>
    tpu.vector_store %arg7[%c0_42, %c0_43, %c0_44], %67 {strides = array<i32>} : memref<1x8x1xf32, #tpu.memory_space<vmem>>, vector<1x8x1xf32>,
    return
  }
  func.func @transform_0(%arg0: i32) -> (i32, i32, i32) {
    %c0_i32 = arith.constant 0 : i32
    %c0_i32_0 = arith.constant 0 : i32
    %c0_i32_1 = arith.constant 0 : i32
    return %arg0, %c0_i32, %c0_i32_0 : i32, i32, i32
  }
  func.func @transform_1(%arg0: i32) -> (i32, i32, i32) {
    %c0_i32 = arith.constant 0 : i32
    %c0_i32_0 = arith.constant 0 : i32
    %c0_i32_1 = arith.constant 0 : i32
    %c0_i32_2 = arith.constant 0 : i32
    return %c0_i32, %c0_i32_0, %c0_i32_1 : i32, i32, i32
  }
  func.func @transform_2(%arg0: i32) -> (i32, i32) {
    %c0_i32 = arith.constant 0 : i32
    %c0_i32_0 = arith.constant 0 : i32
    %c0_i32_1 = arith.constant 0 : i32
    return %c0_i32, %c0_i32_0 : i32, i32
  }
  func.func @transform_3(%arg0: i32) -> (i32, i32) {
    %c0_i32 = arith.constant 0 : i32
    %c0_i32_0 = arith.constant 0 : i32
    %c0_i32_1 = arith.constant 0 : i32
    return %c0_i32, %c0_i32_0 : i32, i32
  }
  func.func @transform_4(%arg0: i32) -> (i32, i32, i32) {
    %c0_i32 = arith.constant 0 : i32
    %c0_i32_0 = arith.constant 0 : i32
    %c0_i32_1 = arith.constant 0 : i32
    return %arg0, %c0_i32, %c0_i32_0 : i32, i32, i32
  }
  func.func @transform_5(%arg0: i32) -> (i32, i32, i32) {
    %c0_i32 = arith.constant 0 : i32
    %c0_i32_0 = arith.constant 0 : i32
    %c0_i32_1 = arith.constant 0 : i32
    return %arg0, %c0_i32, %c0_i32_0 : i32, i32, i32
  }
  func.func @transform_6(%arg0: i32) -> (i32, i32, i32) {
    %c0_i32 = arith.constant 0 : i32
    %c0_i32_0 = arith.constant 0 : i32
    %c0_i32_1 = arith.constant 0 : i32
    return %arg0, %c0_i32, %c0_i32_0 : i32, i32, i32
  }
}

</mosaic_0001>

<bundles_post_ra>
// kernel: tpu_custom_call.1
= control target key start
LH: loop header
LB: loop body
LE: loop exit
PB: predicated region body
PF: predicated region fallthrough
CT: control target
= control target key end

     0   :  { %12 = vsyncpa [#allocation3], 0  ;;  %s1735_s0 = inlined_call_operand.vmem [shape: f32[2,4,512], index: 0, kind: input, shape index: {}]   ;;  %s1736_s1 = inlined_call_operand.vmem [shape: f32[9,8,4], index: 1, kind: input, shape index: {}]   ;;  %s1737_s2 = inlined_call_operand.vmem [shape: f32[8,1], index: 2, kind: input, shape index: {}]   ;;  %s1738_s3 = inlined_call_operand.vmem [shape: f32[1,384], index: 3, kind: input, shape index: {}]   ;;  %s1739_s4 = inlined_call_operand.hbm [shape: f32[2,8,384], index: 4, kind: output, shape index: {0}]   ;;  %s1740_s5 = inlined_call_operand.vmem [shape: f32[2,8,1], index: 5, kind: output, shape index: {1}]   ;;  %s1741_s6 = inlined_call_operand.vmem [shape: f32[2,8,1], index: 6, kind: output, shape index: {2}]  }
   0x1   :  { %14 = vsyncpa [#allocation3 + $0x1], 0  ;;  %s1503_s21 = smov 0   ;;  %s1505_s22 = smov 0  }
   0x2   :  { %s1507_s23 = smov 0   ;;  %s1509_s24 = smov 0  }
   0x3 LB: > { %s1524_s25 = sadd.s32 4294967295, %s1457_s24   ;;  %s1269_s26 = sadd.s32 4294967294, %s1457_s24   ;;  %s1457_s24 = sphi %s1509_s24, %s1747_s24   ;;  %s1453_s23 = sphi %s1507_s23, %s1746_s23   ;;  %s1449_s22 = sphi %s1505_s22, %s1745_s22   ;;  %s1445_s21 = sphi %s1503_s21, %s1744_s21  }
   0x4   : > { %s1528_s27 = sadd.s32 1, %s1457_s24   ;;  %s116_s28 = sadd.s32 1, %s1453_s23 }
   0x5   : > { %s113_s29 = ssub.s32 %s1457_s24, %s1528_s27  ;;  %p126_p0 = scmp.ne.s32.totalorder %s1453_s23, %s1449_s22 }
   0x6   : > { %p114_p1 = scmp.eq.s32.totalorder %s113_s29, 0  ;;  %p127_p2 = scmp.eq.s32.totalorder %s1524_s25, 1 }
   0x7   : > { %p132_p3 = scmp.ne.s32.totalorder %s1449_s22, %s1445_s21  ;;  %p133_p4 = scmp.eq.s32.totalorder %s1269_s26, 1 }
   0x8   : > { %s1539_s30 = scalar_select %p114_p1, %s1453_s23, %s116_s28  }
   0x9   : > { %p1541_p5 = por %p127_p2, %p126_p0  ;;  %p1545_p6 = por %p133_p4, %p132_p3 }
   0xa   : > { %p1272_p7 = scmp.ge.s32.totalorder %s1457_s24, 1  ;;  %p220_p8 = scmp.lt.s32.totalorder %s1457_s24, 3 }
   0xc   : > { %p221_p9 = pnand %p1272_p7, %p220_p8 }
   0xd   : > { %p258_p10 = scmp.lt.s32.totalorder (!%p221_p9), %s1524_s25, 1  ;;  %s1459_s14 = smov (!%p221_p9), 127  }
   0xe   : > { %224 = sbr.rel (%p221_p9) target bundleno = 494 (0x1ee), region = 36  ;;  %s1460_s15 = smov (!%p221_p9), 126  }
   0xf   : > { %s1461_s16 = smov (!%p221_p9), 110   ;;  %s1462_s17 = smov (!%p221_p9), 109  }
  0x10   : > { %s1463_s18 = smov (!%p221_p9), 108   ;;  %s1464_s19 = smov (!%p221_p9), 92  }
  0x11   : > { %s1465_s20 = smov (!%p221_p9), 91   ;;  %s1466_s26 = smov (!%p221_p9), 90  }
  0x13   : > { %s1553_s9 = scalar_select %p258_p10, %s1524_s25, 1  ;;  %vm301_vm0 = vcmask 1043456   ;;  %vm297_vm1 = vcmask 31744   ;;  %v273_v38 = vld [vmem:[%s1736_s1] sm:$0xff]  ;;  %vm293_vm2 = vcmask 1039360   ;;  %vm460_vm3 = vcmask 1031168  }
  0x14   : > { %v1277_v49 = vld [vmem:[%s1736_s1 + $0x8] sm:$0xff]  ;;  %vm553_vm4 = vcmask 900096   ;;  %v1290_v53 = vld [vmem:[%s1736_s1 + $0x10] sm:$0xff]  ;;  %v1297_v59 = vld [vmem:[%s1736_s1 + $0x18] sm:$0xff]  ;;  %vm646_vm5 = vcmask 891904   ;;  %vm739_vm6 = vcmask 883712  }
  0x15   : > { %s1342_s10 = sshll.u32 %s1553_s9, 4  ;;  %vm832_vm7 = vcmask 752640   ;;  %vm925_vm8 = vcmask 744448   ;;  %vm1018_vm9 = vcmask 736256  }
  0x16   : > { %s262_s13 = scalar_lea.vmem %s1735_s0, %s1342_s10 }
  0x17   : > { %v1559_v0 = vld [vmem:[%s262_s13 + $0x8] sm:$0xff]  ;;  %v1561_v1 = vld [vmem:[%s262_s13] sm:$0xff] }
  0x18   : > { %280 = vst [vmem:[#allocation1 + $0x10] ss:$2 sm:$0xff] %v1559_v0 }
  0x19   : > { %278 = vst [vmem:[#allocation1] ss:$2 sm:$0xff] %v1561_v1 }
  0x1f   : > { %v283_v2 = vld.sshfl [vmem:[#allocation1 + $0x10] sm:$0xff pattern:$0x75316420]  ;;  %v284_v3 = vld.sshfl [vmem:[#allocation1 + $0x18] sm:$0xff pattern:$0x75316420] }
  0x20   : > { %289 = vrot.lane.b32.xlu0 %v283_v2, %s1459_s14  ;;  %v281_v4 = vld.sshfl [vmem:[#allocation1] sm:$0xff pattern:$0x75316420]  ;;  %370 = vst [vmem:[#allocation1 + $0x10] ss:$2 sm:$0xff] %v1559_v0 }
  0x21   : > { %285 = vrot.lane.b32.xlu1 %v281_v4, %s1459_s14  ;;  %v282_v5 = vld.sshfl [vmem:[#allocation1 + $0x8] sm:$0xff pattern:$0x75316420]  ;;  %v1304_v2 = vld [vmem:[%s1736_s1 + $0x20] sm:$0xff] }
  0x22   : > { %368 = vst [vmem:[#allocation1] ss:$2 sm:$0xff] %v1561_v1 }
  0x27   : > { %v1567_v6 = vld.sshfl [vmem:[#allocation1 + $0x10] sm:$0xff pattern:$0x75316420] }
  0x28   : > { %291 = vrot.lane.b32.xlu0 %v284_v3, %s1459_s14  ;;  %447 = vst [vmem:[#allocation1 + $0x10] ss:$2 sm:$0xff] %v1559_v0 }
  0x29   : > { %287 = vrot.lane.b32.xlu1 %v282_v5, %s1459_s14  ;;  %v1570_v7 = vld.sshfl [vmem:[#allocation1] sm:$0xff pattern:$0x75316420]  ;;  %v1572_v8 = vld.sshfl [vmem:[#allocation1 + $0x8] sm:$0xff pattern:$0x75316420] }
  0x2a   : > { %445 = vst [vmem:[#allocation1] ss:$2 sm:$0xff] %v1561_v1  ;;  %1284 = vmatpush.msk.msra.mxu3 %vm301_vm0, %v1570_v7  ;;  %s243_s14 = sand.u32 1, %s1449_s22  }
  0x2b   : > { %1285 = vmatmul.msk.f32.vlgmr.msra.gmra.mxu3 %vm297_vm1, %v273_v38  ;;  %s1132_s10 = scalar_lea.sflag [#allocation3], %s243_s14 }
  0x2f   : > { %v450_v9 = vld.sshfl [vmem:[#allocation1 + $0x10] sm:$0xff pattern:$0x75316420]  ;;  %v451_v10 = vld.sshfl [vmem:[#allocation1 + $0x18] sm:$0xff pattern:$0x75316420] }
  0x30   : > { %456 = vrot.lane.b32.xlu0 %v450_v9, %s1460_s15  ;;  %540 = vst [vmem:[#allocation1 + $0x10] ss:$2 sm:$0xff] %v1559_v0 }
  0x31   : > { %v448_v11 = vld.sshfl [vmem:[#allocation1] sm:$0xff pattern:$0x75316420]  ;;  %v449_v12 = vld.sshfl [vmem:[#allocation1 + $0x8] sm:$0xff pattern:$0x75316420] }
  0x32   : > { %452 = vrot.lane.b32.xlu2 %v448_v11, %s1460_s15  ;;  %538 = vst [vmem:[#allocation1] ss:$2 sm:$0xff] %v1561_v1 }
  0x37   : > { %v543_v13 = vld.sshfl [vmem:[#allocation1 + $0x10] sm:$0xff pattern:$0x75316420]  ;;  %v544_v14 = vld.sshfl [vmem:[#allocation1 + $0x18] sm:$0xff pattern:$0x75316420] }
  0x38   : > { %458 = vrot.lane.b32.xlu0 %v451_v10, %s1460_s15  ;;  %633 = vst [vmem:[#allocation1 + $0x10] ss:$2 sm:$0xff] %v1559_v0  ;;  %v1311_v10 = vld [vmem:[%s1736_s1 + $0x28] sm:$0xff] }
  0x39   : > { %v542_v15 = vld.sshfl [vmem:[#allocation1 + $0x8] sm:$0xff pattern:$0x75316420]  ;;  %v541_v16 = vld.sshfl [vmem:[#allocation1] sm:$0xff pattern:$0x75316420] }
  0x3a   : > { %547 = vrot.lane.b32.xlu1 %v542_v15, %s1461_s16  ;;  %454 = vrot.lane.b32.xlu2 %v449_v12, %s1460_s15  ;;  %631 = vst [vmem:[#allocation1] ss:$2 sm:$0xff] %v1561_v1  ;;  %s1343_s15 = smul.u32 24, %s243_s14 }
  0x3c   : > { %s245_s28 = scalar_lea.vmem [#allocation2], %s1343_s15 }
  0x3f   : > { %v636_v17 = vld.sshfl [vmem:[#allocation1 + $0x10] sm:$0xff pattern:$0x75316420]  ;;  %v637_v18 = vld.sshfl [vmem:[#allocation1 + $0x18] sm:$0xff pattern:$0x75316420] }
  0x40   : > { %642 = vrot.lane.b32.xlu0 %v636_v17, %s1462_s17  ;;  %726 = vst [vmem:[#allocation1 + $0x10] ss:$2 sm:$0xff] %v1559_v0  ;;  %v1318_v17 = vld [vmem:[%s1736_s1 + $0x30] sm:$0xff] }
  0x41   : > { %v634_v19 = vld.sshfl [vmem:[#allocation1] sm:$0xff pattern:$0x75316420]  ;;  %v635_v20 = vld.sshfl [vmem:[#allocation1 + $0x8] sm:$0xff pattern:$0x75316420] }
  0x42   : > { %545 = vrot.lane.b32.xlu1 %v541_v16, %s1461_s16  ;;  %549 = vrot.lane.b32.xlu2 %v543_v13, %s1461_s16  ;;  %724 = vst [vmem:[#allocation1] ss:$2 sm:$0xff] %v1561_v1 }
  0x47   : > { %v729_v21 = vld.sshfl [vmem:[#allocation1 + $0x10] sm:$0xff pattern:$0x75316420]  ;;  %v730_v22 = vld.sshfl [vmem:[#allocation1 + $0x18] sm:$0xff pattern:$0x75316420] }
  0x48   : > { %640 = vrot.lane.b32.xlu0 %v635_v20, %s1462_s17  ;;  %819 = vst [vmem:[#allocation1 + $0x10] ss:$2 sm:$0xff] %v1559_v0 }
  0x49   : > { %v727_v23 = vld.sshfl [vmem:[#allocation1] sm:$0xff pattern:$0x75316420]  ;;  %v728_v24 = vld.sshfl [vmem:[#allocation1 + $0x8] sm:$0xff pattern:$0x75316420] }
  0x4a   : > { %644 = vrot.lane.b32.xlu1 %v637_v18, %s1462_s17  ;;  %551 = vrot.lane.b32.xlu2 %v544_v14, %s1461_s16  ;;  %817 = vst [vmem:[#allocation1] ss:$2 sm:$0xff] %v1561_v1  ;;  %s1415_s16 = scalar_lea.hbm %s1739_s4, 48 }
  0x4f   : > { %v822_v25 = vld.sshfl [vmem:[#allocation1 + $0x10] sm:$0xff pattern:$0x75316420]  ;;  %v823_v26 = vld.sshfl [vmem:[#allocation1 + $0x18] sm:$0xff pattern:$0x75316420] }
  0x50   : > { %737 = vrot.lane.b32.xlu0 %v730_v22, %s1463_s18  ;;  %912 = vst [vmem:[#allocation1 + $0x10] ss:$2 sm:$0xff] %v1559_v0  ;;  %v1094_v22 = vld [vmem:[%s1737_s2] sm:$0xff] }
  0x51   : > { %v821_v27 = vld.sshfl [vmem:[#allocation1 + $0x8] sm:$0xff pattern:$0x75316420]  ;;  %v820_v28 = vld.sshfl [vmem:[#allocation1] sm:$0xff pattern:$0x75316420] }
  0x52   : > { %731 = vrot.lane.b32.xlu1 %v727_v23, %s1463_s18  ;;  %638 = vrot.lane.b32.xlu2 %v634_v19, %s1462_s17  ;;  %910 = vst [vmem:[#allocation1] ss:$2 sm:$0xff] %v1561_v1  ;;  %v1325_v19 = vld [vmem:[%s1736_s1 + $0x38] sm:$0xff]  ;;  %v1467_v23 = vmov 0  }
  0x53   : > { %1393 = vset.pattern.permute.xlu2 %v1467_v23  ;;  %1394 = vset.pattern.permute.xlu0 %v1467_v23 }
  0x57   : > { %v915_v29 = vld.sshfl [vmem:[#allocation1 + $0x10] sm:$0xff pattern:$0x75316420]  ;;  %v916_v30 = vld.sshfl [vmem:[#allocation1 + $0x18] sm:$0xff pattern:$0x75316420] }
  0x58   : > { %824 = vrot.lane.b32.xlu0 %v820_v28, %s1464_s19  ;;  %1005 = vst [vmem:[#allocation1 + $0x10] ss:$2 sm:$0xff] %v1559_v0 }
  0x59   : > { %v914_v31 = vld.sshfl [vmem:[#allocation1 + $0x8] sm:$0xff pattern:$0x75316420]  ;;  %v913_v32 = vld.sshfl [vmem:[#allocation1] sm:$0xff pattern:$0x75316420] }
  0x5a   : > { %826 = vrot.lane.b32.xlu1 %v821_v27, %s1464_s19  ;;  %733 = vrot.lane.b32.xlu2 %v728_v24, %s1463_s18  ;;  %1003 = vst [vmem:[#allocation1] ss:$2 sm:$0xff] %v1561_v1 }
  0x5f   : > { %v1008_v34 = vld.sshfl [vmem:[#allocation1 + $0x10] sm:$0xff pattern:$0x75316420]  ;;  %v1009_v36 = vld.sshfl [vmem:[#allocation1 + $0x18] sm:$0xff pattern:$0x75316420] }
  0x60   : > { %921 = vrot.lane.b32.xlu0 %v915_v29, %s1465_s20 }
  0x61   : > { %v1006_v33 = vld.sshfl [vmem:[#allocation1] sm:$0xff pattern:$0x75316420]  ;;  %v1007_v35 = vld.sshfl [vmem:[#allocation1 + $0x8] sm:$0xff pattern:$0x75316420] }
  0x62   : > { %828 = vrot.lane.b32.xlu1 %v822_v25, %s1464_s19  ;;  %735 = vrot.lane.b32.xlu2 %v729_v21, %s1463_s18  ;;  %s1344_s18 = smul.u32 24, %s1524_s25  ;;  %s1153_s25 = sshll.u32 %s245_s28, 4  ;;  %s1154_s25 = int_to_ptr.vmem [resolvable:$true] %s1153_s25 }
  0x68   : > { %923 = vrot.lane.b32.xlu0 %v916_v30, %s1465_s20 }
  0x6a   : > { %830 = vrot.lane.b32.xlu1 %v823_v26, %s1464_s19  ;;  %919 = vrot.lane.b32.xlu2 %v914_v31, %s1465_s20 }
  0x70   : > { %1010 = vrot.lane.b32.xlu0 %v1006_v33, %s1466_s26 }
  0x72   : > { %1014 = vrot.lane.b32.xlu1 %v1008_v34, %s1466_s26  ;;  %917 = vrot.lane.b32.xlu2 %v913_v32, %s1465_s20  ;;  %v1332_v34 = vld [vmem:[%s1736_s1 + $0x40] sm:$0xff] }
  0x7a   : > { %1012 = vrot.lane.b32.xlu1 %v1007_v35, %s1466_s26  ;;  %1016 = vrot.lane.b32.xlu2 %v1009_v36, %s1466_s26  ;;  %s1151_s26 = scalar_lea.hbm %s1739_s4, %s1344_s18 }
  0x7b   : > { %s1155_s29 = sshll.u32 %s1151_s26, 4  ;;  %s1156_s29 = int_to_ptr.hbm [resolvable:$true] %s1155_s29 }
  0x7c   : > { %s1409_s11 = sshra.s32 %s1156_s29, 4  ;;  %s1410_s11 = int_to_ptr.hbm [resolvable:$true] %s1409_s11 }
  0x7d   : > { %s1411_s12 = scalar_lea.hbm %s1410_s11, 24  ;;  %p1416_p0 = scmp.lt.s32.totalorder %s1410_s11, %s1739_s4 }
  0x7e   : > { %p1412_p11 = scmp.ne.s32.totalorder %s1410_s11, %s1411_s12  ;;  %p1417_p1 = scmp.lt.s32.totalorder %s1415_s16, %s1411_s12 }
  0x80   : > { %p1413_p12 = pnand %p1412_p11, %p1541_p5  ;;  %p1418_p2 = por %p1417_p1, %p1416_p0 }
  0x82   : > { %1097 = vperm.xlu2 %1393, %v1094_v22   ;;  %p1414_p13 = pneg %p1413_p12 }
  0x84   : > { %p1419_p3 = pnand %p1418_p2, %p1414_p13 }
  0x8c   : > { %v453_v37 = vpop.permute.xlu2 %452 }
  0x92   : > { %v290_v39 = vpop.permute.xlu0 %289 }
  0x93   : > { %v286_v40 = vpop.permute.xlu1 %285 }
  0x94   : > { %v455_v41 = vpop.permute.xlu2 %454 }
  0x95   : > { %v461_v45 = vsel %vm460_vm3, %v453_v37, %v455_v41 }
  0x9a   : > { %v292_v42 = vpop.permute.xlu0 %291 }
  0x9b   : > { %v288_v43 = vpop.permute.xlu1 %287  ;;  %v296_v44 = vsel %vm293_vm2, %v290_v39, %v292_v42 }
  0x9c   : > { %v294_v46 = vsel %vm293_vm2, %v286_v40, %v288_v43  ;;  %v295_v47 = vsel %vm293_vm2, %v288_v43, %v290_v39  ;;  %1282 = vmatpush.msk.msra.mxu2 %vm301_vm0, %v296_v44  ;;  %v550_v48 = vpop.permute.xlu2 %549 }
  0x9d   : > { %1278 = vmatpush.msk.msra.mxu0 %vm301_vm0, %v294_v46  ;;  %1280 = vmatpush.msk.msra.mxu1 %vm301_vm0, %v295_v47 }
  0x9e   : > { %1291 = vmatpush.msk.msrb.mxu2 %vm301_vm0, %v461_v45  ;;  %1279 = vmatmul.msk.f32.vlgmr.msra.gmra.mxu0 %vm297_vm1, %v1277_v49 }
  0x9f   : > { %1286 = vmatpush.msk.msrb.mxu0 %vm301_vm0, %v1572_v8  ;;  %1283 = vmatmul.msk.f32.vlgmr.msra.gmra.mxu2 %vm297_vm1, %v1277_v49 }
  0xa0   : > { %1281 = vmatmul.msk.f32.vlgmr.msra.gmra.mxu1 %vm297_vm1, %v1277_v49 }
  0xa1   : > { %1288 = vmatpush.msk.msrb.mxu1 %vm301_vm0, %v1567_v6 }
  0xa2   : > { %v457_v50 = vpop.permute.xlu0 %456 }
  0xa3   : > { %v462_v51 = vsel %vm460_vm3, %v455_v41, %v457_v50 }
  0xa4   : > { %1293 = vmatpush.msk.msrb.mxu3 %vm301_vm0, %v462_v51  ;;  %v552_v52 = vpop.permute.xlu2 %551 }
  0xa5   : > { %v556_v54 = vsel %vm553_vm4, %v550_v48, %v552_v52  ;;  %1294 = vmatmul.msk.f32.vlgmr.msrb.gmra.mxu3 %vm297_vm1, %v1290_v53 }
  0xa6   : > { %1302 = vmatpush.msk.msra.mxu3 %vm301_vm0, %v556_v54  ;;  %1287 = vmatmul.msk.f32.vlgmr.msrb.gmra.mxu0 %vm297_vm1, %v273_v38 }
  0xa7   : > { %1292 = vmatmul.msk.f32.vlgmr.msrb.gmra.mxu2 %vm297_vm1, %v1290_v53 }
  0xa8   : > { %1289 = vmatmul.msk.f32.vlgmr.msrb.gmra.mxu1 %vm297_vm1, %v273_v38 }
  0xaa   : > { %v459_v55 = vpop.permute.xlu0 %458 }
  0xab   : > { %v463_v56 = vsel %vm460_vm3, %v457_v50, %v459_v55 }
  0xac   : > { %v548_v57 = vpop.permute.xlu1 %547  ;;  %1295 = vmatpush.msk.msra.mxu0 %vm301_vm0, %v463_v56  ;;  %v639_v58 = vpop.permute.xlu2 %638 }
  0xad   : > { %v555_v60 = vsel %vm553_vm4, %v548_v57, %v550_v48  ;;  %1303 = vmatmul.msk.f32.vlgmr.msra.gmra.mxu3 %vm297_vm1, %v1297_v59 }
  0xae   : > { %1300 = vmatpush.msk.msra.mxu2 %vm301_vm0, %v555_v60  ;;  %1296 = vmatmul.msk.f32.vlgmr.msra.gmra.mxu0 %vm297_vm1, %v1290_v53  ;;  %v400_v43 = vpop.f32.mrf.mxu3 }
  0xaf   : > { %1301 = vmatmul.msk.f32.vlgmr.msra.gmra.mxu2 %vm297_vm1, %v1297_v59 }
  0xb2   : > { %v643_v61 = vpop.permute.xlu0 %642 }
  0xb4   : > { %v546_v62 = vpop.permute.xlu1 %545  ;;  %v734_v63 = vpop.permute.xlu2 %733 }
  0xb5   : > { %v554_v0 = vsel %vm553_vm4, %v546_v62, %v548_v57 }
  0xb6   : > { %1298 = vmatpush.msk.msra.mxu1 %vm301_vm0, %v554_v0 }
  0xb7   : > { %1299 = vmatmul.msk.f32.vlgmr.msra.gmra.mxu1 %vm297_vm1, %v1297_v59 }
  0xba   : > { %v641_v1 = vpop.permute.xlu0 %640 }
  0xbb   : > { %v647_v3 = vsel %vm646_vm5, %v639_v58, %v641_v1  ;;  %v648_v4 = vsel %vm646_vm5, %v641_v1, %v643_v61 }
  0xbc   : > { %v645_v5 = vpop.permute.xlu1 %644  ;;  %1307 = vmatpush.msk.msrb.mxu1 %vm301_vm0, %v648_v4  ;;  %1305 = vmatpush.msk.msrb.mxu0 %vm301_vm0, %v647_v3  ;;  %v736_v6 = vpop.permute.xlu2 %735 }
  0xbd   : > { %v649_v7 = vsel %vm646_vm5, %v643_v61, %v645_v5  ;;  %v741_v8 = vsel %vm739_vm6, %v734_v63, %v736_v6  ;;  %1306 = vmatmul.msk.f32.vlgmr.msrb.gmra.mxu0 %vm297_vm1, %v1304_v2 }
  0xbe   : > { %1309 = vmatpush.msk.msrb.mxu2 %vm301_vm0, %v649_v7  ;;  %1314 = vmatpush.msk.msra.mxu0 %vm301_vm0, %v741_v8 }
  0xbf   : > { %1308 = vmatmul.msk.f32.vlgmr.msrb.gmra.mxu1 %vm297_vm1, %v1304_v2  ;;  %1310 = vmatmul.msk.f32.vlgmr.msrb.gmra.mxu2 %vm297_vm1, %v1304_v2 }
  0xc2   : > { %v738_v9 = vpop.permute.xlu0 %737 }
  0xc3   : > { %v742_v11 = vsel %vm739_vm6, %v736_v6, %v738_v9 }
  0xc4   : > { %v732_v12 = vpop.permute.xlu1 %731  ;;  %v920_v13 = vpop.permute.xlu2 %919  ;;  %1316 = vmatpush.msk.msra.mxu1 %vm301_vm0, %v742_v11 }
  0xc5   : > { %v740_v14 = vsel %vm739_vm6, %v732_v12, %v734_v63  ;;  %1315 = vmatmul.msk.f32.vlgmr.msra.gmra.mxu0 %vm297_vm1, %v1311_v10 }
  0xc6   : > { %1312 = vmatpush.msk.msrb.mxu3 %vm301_vm0, %v740_v14 }
  0xc7   : > { %1313 = vmatmul.msk.f32.vlgmr.msrb.gmra.mxu3 %vm297_vm1, %v1311_v10  ;;  %1317 = vmatmul.msk.f32.vlgmr.msra.gmra.mxu1 %vm297_vm1, %v1311_v10 }
  0xca   : > { %v825_v15 = vpop.permute.xlu0 %824 }
  0xcc   : > { %v827_v16 = vpop.permute.xlu1 %826  ;;  %v918_v18 = vpop.permute.xlu2 %917 }
  0xcd   : > { %v833_v20 = vsel %vm832_vm7, %v825_v15, %v827_v16  ;;  %v926_v21 = vsel %vm925_vm8, %v918_v18, %v920_v13 }
  0xce   : > { %1319 = vmatpush.msk.msra.mxu2 %vm301_vm0, %v833_v20  ;;  %1326 = vmatpush.msk.msrb.mxu1 %vm301_vm0, %v926_v21 }
  0xcf   : > { %1320 = vmatmul.msk.f32.vlgmr.msra.gmra.mxu2 %vm297_vm1, %v1318_v17  ;;  %1327 = vmatmul.msk.f32.vlgmr.msrb.gmra.mxu1 %vm297_vm1, %v1325_v19 }
  0xd2   : > { %v922_v24 = vpop.permute.xlu0 %921 }
  0xd3   : > { %v927_v25 = vsel %vm925_vm8, %v920_v13, %v922_v24 }
  0xd4   : > { %v829_v26 = vpop.permute.xlu1 %828  ;;  %1328 = vmatpush.msk.msrb.mxu2 %vm301_vm0, %v927_v25  ;;  %v1017_v32 = vpop.permute.xlu2 %1016 }
  0xd5   : > { %v834_v27 = vsel %vm832_vm7, %v827_v16, %v829_v26 }
  0xd6   : > { %1321 = vmatpush.msk.msra.mxu3 %vm301_vm0, %v834_v27 }
  0xd7   : > { %1322 = vmatmul.msk.f32.vlgmr.msra.gmra.mxu3 %vm297_vm1, %v1318_v17  ;;  %1329 = vmatmul.msk.f32.vlgmr.msrb.gmra.mxu2 %vm297_vm1, %v1325_v19 }
  0xda   : > { %v924_v28 = vpop.permute.xlu0 %923 }
  0xdb   : > { %v928_v29 = vsel %vm925_vm8, %v922_v24, %v924_v28 }
  0xdc   : > { %v831_v30 = vpop.permute.xlu1 %830  ;;  %1330 = vmatpush.msk.msrb.mxu3 %vm301_vm0, %v928_v29  ;;  %v1098_v21 = vpop.permute.xlu2 %1097 }
  0xdd   : > { %v835_v31 = vsel %vm832_vm7, %v829_v26, %v831_v30 }
  0xde   : > { %1323 = vmatpush.msk.msrb.mxu0 %vm301_vm0, %v835_v31 }
  0xdf   : > { %1324 = vmatmul.msk.f32.vlgmr.msrb.gmra.mxu0 %vm297_vm1, %v1318_v17  ;;  %1331 = vmatmul.msk.f32.vlgmr.msrb.gmra.mxu3 %vm297_vm1, %v1325_v19  ;;  %v1106_v19 = vld [vmem:[%s1738_s3] sm:$0x7] }
  0xe0   : > { %v1108_v26 = vperm.slane %v1106_v19, 0  ;;  %v1110_v28 = vperm.slane %v1106_v19, 2 }
  0xe2   : > { %v1011_v36 = vpop.permute.xlu0 %1010 }
  0xe4   : > { %v1015_v33 = vpop.permute.xlu1 %1014 }
  0xe5   : > { %v1021_v35 = vsel %vm1018_vm9, %v1015_v33, %v1017_v32  ;;  %v1109_v32 = vperm.slane %v1106_v19, 1 }
  0xe6   : > { %1337 = vmatpush.msk.msra.mxu2 %vm301_vm0, %v1021_v35 }
  0xe7   : > { %1338 = vmatmul.msk.f32.vlgmr.msra.gmra.mxu2 %vm297_vm1, %v1332_v34 }
  0xec   : > { %v1013_v37 = vpop.permute.xlu1 %1012 }
  0xed   : > { %v1020_v38 = vsel %vm1018_vm9, %v1013_v37, %v1015_v33  ;;  %v1019_v39 = vsel %vm1018_vm9, %v1011_v36, %v1013_v37 }
  0xee   : > { %1333 = vmatpush.msk.msra.mxu0 %vm301_vm0, %v1019_v39  ;;  %1335 = vmatpush.msk.msra.mxu1 %vm301_vm0, %v1020_v38 }
  0xef   : > { %1334 = vmatmul.msk.f32.vlgmr.msra.gmra.mxu0 %vm297_vm1, %v1332_v34  ;;  %1336 = vmatmul.msk.f32.vlgmr.msra.gmra.mxu1 %vm297_vm1, %v1332_v34 }
 0x11b   : > { %v325_v40 = vpop.f32.mrf.mxu0 }
 0x11c   : > { %v401_v58 = vadd.f32 %v400_v43, %v325_v40 }
 0x11d   : > { %v345_v41 = vpop.f32.mrf.mxu1 }
 0x122   : > { %v365_v42 = vpop.f32.mrf.mxu2 }
 0x123   : > { %v420_v44 = vpop.f32.mrf.mxu0 }
 0x124   : > { %v421_v56 = vadd.f32 %v420_v44, %v345_v41 }
 0x125   : > { %v440_v45 = vpop.f32.mrf.mxu1 }
 0x126   : > { %v441_v57 = vadd.f32 %v440_v45, %v365_v42 }
 0x128   : > { %v510_v47 = vpop.f32.mrf.mxu3 }
 0x129   : > { %v534_v59 = vadd.f32 %v510_v47, %v421_v56 }
 0x12a   : > { %v490_v46 = vpop.f32.mrf.mxu2 }
 0x12b   : > { %v530_v48 = vpop.f32.mrf.mxu0  ;;  %v533_v62 = vadd.f32 %v490_v46, %v401_v58 }
 0x12c   : > { %v535_v60 = vadd.f32 %v530_v48, %v441_v57 }
 0x130   : > { %v623_v51 = vpop.f32.mrf.mxu3 }
 0x131   : > { %v628_v3 = vadd.f32 %v623_v51, %v535_v60 }
 0x132   : > { %v603_v50 = vpop.f32.mrf.mxu2 }
 0x133   : > { %v627_v2 = vadd.f32 %v603_v50, %v534_v59 }
 0x134   : > { %v583_v49 = vpop.f32.mrf.mxu1 }
 0x135   : > { %v626_v4 = vadd.f32 %v583_v49, %v533_v62 }
 0x13a   : > { %v676_v52 = vpop.f32.mrf.mxu0 }
 0x13b   : > { %v719_v8 = vadd.f32 %v676_v52, %v626_v4 }
 0x13c   : > { %v696_v53 = vpop.f32.mrf.mxu1 }
 0x13d   : > { %v720_v5 = vadd.f32 %v696_v53, %v627_v2 }
 0x142   : > { %v716_v54 = vpop.f32.mrf.mxu2  ;;  %v789_v63 = vpop.f32.mrf.mxu0 }
 0x143   : > { %v721_v6 = vadd.f32 %v716_v54, %v628_v3  ;;  %v813_v12 = vadd.f32 %v789_v63, %v720_v5 }
 0x144   : > { %v809_v0 = vpop.f32.mrf.mxu1 }
 0x145   : > { %v814_v13 = vadd.f32 %v809_v0, %v721_v6 }
 0x14a   : > { %v769_v55 = vpop.f32.mrf.mxu3 }
 0x14b   : > { %v812_v11 = vadd.f32 %v769_v55, %v719_v8 }
 0x14c   : > { %v955_v9 = vpop.f32.mrf.mxu1 }
 0x152   : > { %v862_v61 = vpop.f32.mrf.mxu2 }
 0x153   : > { %v905_v15 = vadd.f32 %v862_v61, %v812_v11 }
 0x155   : > { %v998_v22 = vadd.f32 %v955_v9, %v905_v15 }
 0x15a   : > { %v882_v1 = vpop.f32.mrf.mxu3  ;;  %v975_v7 = vpop.f32.mrf.mxu2 }
 0x15b   : > { %v906_v16 = vadd.f32 %v882_v1, %v813_v12 }
 0x15c   : > { %v902_v10 = vpop.f32.mrf.mxu0 }
 0x15d   : > { %v907_v17 = vadd.f32 %v902_v10, %v814_v13  ;;  %v999_v23 = vadd.f32 %v975_v7, %v906_v16 }
 0x162   : > { %v995_v14 = vpop.f32.mrf.mxu3 }
 0x163   : > { %v1000_v18 = vadd.f32 %v995_v14, %v907_v17 }
 0x16a   : > { %v1088_v20 = vpop.f32.mrf.mxu2 }
 0x16b   : > { %v1093_v24 = vadd.f32 %v1088_v20, %v1000_v18 }
 0x16c   : > { %v1048_v25 = vpop.f32.mrf.mxu0  ;;  %v1068_v27 = vpop.f32.mrf.mxu1 }
 0x16d   : > { %v1102_v29 = vadd.f32 %v1098_v21, %v1093_v24  ;;  %v1091_v30 = vadd.f32 %v1048_v25, %v998_v22  ;;  %v1092_v31 = vadd.f32 %v1068_v27, %v999_v23 }
 0x16f   : > { %1105 = vst [vmem:[%s245_s28 + $0x10] sm:$0xff] %v1102_v29  ;;  %v1100_v33 = vadd.f32 %v1098_v21, %v1091_v30  ;;  %v1101_v34 = vadd.f32 %v1098_v21, %v1092_v31  ;;  %v1116_v37 = vmul.f32 %v1110_v28, %v1102_v29 }
 0x171   : > { %1103 = vst [vmem:[%s245_s28] sm:$0xff] %v1100_v33  ;;  %v1114_v35 = vmul.f32 %v1108_v26, %v1100_v33  ;;  %v1115_v36 = vmul.f32 %v1109_v32, %v1101_v34 }
 0x172   : > { %1104 = vst [vmem:[%s245_s28 + $0x8] sm:$0xff] %v1101_v34 }
 0x173   : > { %v1117_v38 = vadd.f32 %v1115_v36, %v1114_v35  ;;  %v1123_v39 = vmul.f32 %v1114_v35, %v1114_v35  ;;  %v1124_v40 = vmul.f32 %v1115_v36, %v1115_v36 }
 0x174   : > { %1422 = shalt.err (!%p1419_p3)
}
 0x175   : > { %1345 = dma.vmem_to_hbm [thread:$0]  (%p1541_p5), %s1154_s25, 384, %s1156_s29, %s1132_s10   ;;  %v1118_v41 = vadd.f32 %v1117_v38, %v1116_v37  ;;  %v1125_v42 = vmul.f32 %v1116_v37, %v1116_v37  ;;  %v1126_v43 = vadd.f32 %v1124_v40, %v1123_v39  ;;  %vm1121_vm10 = vcmask 7168  }
 0x176   : > { %s1275_s14 = sshll.u32 %s1553_s9, 3 }
 0x177   : > { %1119 = vadd.xlane.f32.xlu0 %v1118_v41  ;;  %v1127_v44 = vadd.f32 %v1126_v43, %v1125_v42  ;;  %s266_s26 = scalar_lea.vmem %s1740_s5, %s1275_s14  ;;  %s270_s12 = scalar_lea.vmem %s1741_s6, %s1275_s14 }
 0x179   : > { %1128 = vadd.xlane.f32.xlu1 %v1127_v44 }
 0x1ea   : > { %v1120_v45 = vpop.xlane.xlu0 %1119 }
 0x1eb   : > { %1122 = vst.msk [vmem:[%s266_s26] sm:$0xff] %vm1121_vm10, %v1120_v45 }
 0x1ec   : > { %v1129_v46 = vpop.xlane.xlu1 %1128 }
 0x1ed   : > { %1130 = vst.msk [vmem:[%s270_s12] sm:$0xff] %vm1121_vm10, %v1129_v46 }
 0x1ee PF: > { %p1351_p4 = scmp.ge.s32.totalorder %s1457_s24, 2  ;;  %s1173_s7 = sand.u32 1, %s1445_s21  }
 0x1ef   : > { %s1174_s9 = scalar_lea.sflag [#allocation3], %s1173_s7 }
 0x1f0   : > { %p1348_p5 = pnand %p1351_p4, %p1545_p6 }
 0x1f2   : > { %p1349_p7 = pneg %p1348_p5 }
 0x1f4   : > { %1440 = dma.done.wait (%p1349_p7), %s1174_s9, 384  }
 0x1f5   : > { %1442 = vsyncadd (%p1349_p7), %s1174_s9, 4294966912  ;;  %p17_p8 = scmp.ge.s32.totalorder %s1528_s27, 4   ;;  %s1744_s21 = smov %s1449_s22 }
 0x1f6   : > { %s1745_s22 = smov %s1453_s23  ;;  %s1746_s23 = smov %s1539_s30 }
 0x1f7   : > { %s1747_s24 = smov %s1528_s27  ;;  %19 = sbr.rel (!%p17_p8) target bundleno = 3 (0x3), region = 112 }
 0x1fc   :  { %1194 = vsyncpa [#allocation3], 1 }
 0x1fd   :  { %1196 = vsyncpa [#allocation3 + $0x1], 1 }

</bundles_post_ra>
